<compile_context>
chip_gen: v7x
topology: tpu7x:2x2x1
jax: 0.10.0
libtpu: 0.0.40
codegen_flags: <defaults>
</compile_context>

<pallas_src>
import jax
import jax.numpy as jnp
from jax.experimental import pallas as pl
from jax.experimental.pallas import tpu as pltpu


_NEG_SLOPE = 0.01  # PyTorch F.leaky_relu default


def _round_up(x, m):
    return ((x + m - 1) // m) * m


def _vmem_capacity_bytes():
    """VMEM per TensorCore (v5e/v6e: 128 MiB, v7x: 64 MiB).  Falls back to the
    smallest (v7x) value if the trace-time query is unavailable."""
    try:
        cap = int(pltpu.get_tpu_info().vmem_capacity_bytes)
        if cap > 0:
            return cap
    except Exception:
        pass
    return 64 << 20


def _largest_divisor_tile(dim, candidates):
    for c in candidates:
        if c <= dim and dim % c == 0:
            return c
    return dim  # fall back to the full extent (single block)


def _leaky_relu(y):
    # mul + max instead of cmp + select
    return jnp.maximum(y, _NEG_SLOPE * y)


# --------------------------------------------------------------------------
# Kernels
# --------------------------------------------------------------------------
def _fused_linear_lrelu_kernel(x_ref, w_ref, b_ref, o_ref):
    # Single K step: dot + bias + LeakyReLU straight from vregs.
    # x_ref: (tm, K)  w_ref: (K, tn)  b_ref: (1, tn)  o_ref: (tm, tn)
    y = jnp.dot(x_ref[...], w_ref[...], preferred_element_type=jnp.float32)
    y = y + b_ref[...]
    o_ref[...] = _leaky_relu(y).astype(o_ref.dtype)


def _tiled_k_linear_lrelu_kernel(x_ref, w_ref, b_ref, o_ref, acc_ref):
    # x_ref: (tm, tk)  w_ref: (tk, tn)  b_ref: (1, tn)
    # o_ref: (tm, tn)  acc_ref: (tm, tn) f32, resident across the K axis.
    k = pl.program_id(2)

    @pl.when(k == 0)
    def _():
        # Initialize with the bias -> saves a separate add pass at finalize.
        acc_ref[...] = jnp.broadcast_to(b_ref[...], acc_ref.shape)

    acc_ref[...] += jnp.dot(x_ref[...], w_ref[...],
                            preferred_element_type=jnp.float32)

    @pl.when(k == pl.num_programs(2) - 1)
    def _():
        o_ref[...] = _leaky_relu(acc_ref[...]).astype(o_ref.dtype)


# --------------------------------------------------------------------------
# Wrapper
# --------------------------------------------------------------------------
def prepare_linear_params(weight, bias, compute_dtype):
    """Hoisted, call-once param prep: transpose W to (in, out) and cast to the
    compute dtype.  Bias is kept in f32 for accurate accumulation."""
    out_ch, in_ch = weight.shape
    w_t = jnp.asarray(weight, compute_dtype).T            # (in_ch, out_ch)
    b2d = jnp.asarray(bias, jnp.float32)[None, :]          # (1, out_ch)
    return w_t, b2d, out_ch


def context_graph_magnn_linear(x_context, w_t, b2d):
    """leaky_relu(x @ W.T + b) with W pre-transposed by prepare_linear_params.
    Returns (N, out_channels) in x's dtype."""
    n, in_ch = x_context.shape
    in_ch_w, out_ch = w_t.shape
    assert in_ch == in_ch_w, "in_channels mismatch between x and weight"

    x_b = jnp.dtype(x_context.dtype).itemsize
    w_b = jnp.dtype(w_t.dtype).itemsize
    o_b = x_b

    # ---- K tiling: exact divisor only (ragged K would accumulate garbage) --
    if in_ch <= 1024:
        tile_k = in_ch
    else:
        tile_k = _largest_divisor_tile(in_ch, (512, 384, 256, 128))
    k_steps = in_ch // tile_k if in_ch % tile_k == 0 else 1
    if k_steps == 1:
        tile_k = in_ch

    # ---- Output-column tiling: lane-dense exact divisor when possible ------
    if out_ch % 128 == 0:
        tile_nc = _largest_divisor_tile(out_ch, (512, 384, 256, 128))
    else:
        # Single full-extent tile (masked stores) -> no post-call slice copy.
        tile_nc = out_ch

    # ---- Node (M) tiling from the per-generation VMEM budget ---------------
    vmem_cap = _vmem_capacity_bytes()
    budget = int(vmem_cap * 0.55)
    acc_b = 4 if k_steps > 1 else 0
    fixed = 2 * tile_k * tile_nc * w_b + 2 * 8 * tile_nc * 4      # W + bias (dbl-buffered)
    per_row = 2 * tile_k * x_b + 2 * tile_nc * o_b + tile_nc * acc_b
    tile_m = max(8, min(4096, ((budget - fixed) // per_row) // 8 * 8))
    tile_m = min(tile_m, _round_up(n, 8))
    # Only split the node axis when each half still gets MXU-friendly work
    # (keeps both v7x TensorCores busy; negligible cost on v5e/v6e).
    if n >= 1024 and pl.cdiv(n, tile_m) < 2:
        tile_m = _round_up(pl.cdiv(n, 2), 8)

    grid_m = pl.cdiv(n, tile_m)
    grid_n = pl.cdiv(out_ch, tile_nc)

    # ---- VMEM limit from the actual footprint, capped below physical -------
    footprint = (2 * tile_m * tile_k * x_b
                 + 2 * tile_k * tile_nc * w_b
                 + 2 * 8 * tile_nc * 4
                 + 2 * tile_m * tile_nc * o_b
                 + tile_m * tile_nc * acc_b)
    vmem_limit = int(min(max(footprint * 1.3, 16 << 20), vmem_cap - (8 << 20)))

    cost = pl.CostEstimate(
        flops=2 * n * in_ch * out_ch,
        transcendentals=0,
        bytes_accessed=(n * in_ch * x_b + in_ch * out_ch * w_b
                        + out_ch * 4 + n * out_ch * o_b))

    out_shape = jax.ShapeDtypeStruct((n, out_ch), x_context.dtype)

    if k_steps == 1:
        # j (output columns) outermost: the W tile's block index is constant
        # across the inner node sweep, so Pallas skips its re-DMA.
        grid_spec = pltpu.PrefetchScalarGridSpec(
            num_scalar_prefetch=0,
            grid=(grid_n, grid_m),
            in_specs=[
                pl.BlockSpec((tile_m, tile_k), lambda j, i: (i, 0)),
                pl.BlockSpec((tile_k, tile_nc), lambda j, i: (0, j)),
                pl.BlockSpec((1, tile_nc), lambda j, i: (0, j)),
            ],
            out_specs=pl.BlockSpec((tile_m, tile_nc), lambda j, i: (i, j)),
        )
        return pl.pallas_call(
            _fused_linear_lrelu_kernel,
            out_shape=out_shape,
            grid_spec=grid_spec,
            compiler_params=pltpu.CompilerParams(
                dimension_semantics=("parallel", "parallel"),
                vmem_limit_bytes=vmem_limit),
            cost_estimate=cost,
        )(x_context, w_t, b2d)

    grid_spec = pltpu.PrefetchScalarGridSpec(
        num_scalar_prefetch=0,
        grid=(grid_n, grid_m, k_steps),
        in_specs=[
            pl.BlockSpec((tile_m, tile_k), lambda j, i, k: (i, k)),
            pl.BlockSpec((tile_k, tile_nc), lambda j, i, k: (k, j)),
            pl.BlockSpec((1, tile_nc), lambda j, i, k: (0, j)),
        ],
        out_specs=pl.BlockSpec((tile_m, tile_nc), lambda j, i, k: (i, j)),
        scratch_shapes=[pltpu.VMEM((tile_m, tile_nc), jnp.float32)],
    )
    return pl.pallas_call(
        _tiled_k_linear_lrelu_kernel,
        out_shape=out_shape,
        grid_spec=grid_spec,
        compiler_params=pltpu.CompilerParams(
            dimension_semantics=("parallel", "parallel", "arbitrary"),
            vmem_limit_bytes=vmem_limit),
        cost_estimate=cost,
    )(x_context, w_t, b2d)


def context_graph_magnn_layer_forward(x_context, params, data_object=None):
    """Mirrors ContextGraphMAGNNLayer.forward (placeholder semantics)."""
    # TODO(synk): actual MAGNN metapath encoding / intra- & inter-metapath
    # attention over `data_object` has no implementation in the PyTorch
    # placeholder either; only the linear + leaky_relu path is realized.
    w_t, b2d, out_ch = params
    if isinstance(x_context, dict):
        first_node_type = list(x_context.keys())[0]
        return {first_node_type: context_graph_magnn_linear(
            x_context[first_node_type], w_t, b2d)}
    if x_context is not None and x_context.size > 0:
        return context_graph_magnn_linear(x_context, w_t, b2d)
    return jnp.zeros((0, out_ch), jnp.float32)


def _reference(x, weight, bias):
    y = x @ jnp.asarray(weight, jnp.float32).T + jnp.asarray(bias, jnp.float32)[None, :]
    return jnp.where(y >= 0.0, y, _NEG_SLOPE * y)


if __name__ == "__main__":
    # Small shapes consistent with the module: N nodes, in_channels features
    # projected to out_channels.
    num_nodes = 16
    in_channels = 32
    out_channels = 64

    key = jax.random.PRNGKey(0)
    kx, kw, kb = jax.random.split(key, 3)

    x_context = jax.random.normal(kx, (num_nodes, in_channels), jnp.float32)
    bound = 1.0 / (in_channels ** 0.5)
    weight = jax.random.uniform(
        kw, (out_channels, in_channels), jnp.float32, -bound, bound)
    bias = jax.random.uniform(kb, (out_channels,), jnp.float32, -bound, bound)

    # Param prep is hoisted out of the per-call path (done once at model init).
    params = prepare_linear_params(weight, bias, x_context.dtype)

    # Tensor path.
    out = context_graph_magnn_layer_forward(x_context, params)
    out = jax.block_until_ready(out)
    ref = _reference(x_context, weight, bias)
    assert out.shape == (num_nodes, out_channels)
    assert jnp.allclose(out, ref, atol=1e-5, rtol=1e-5), "tensor path mismatch"

    # Dict (heterogeneous) path: same linear applied to the first node type.
    out_dict = context_graph_magnn_layer_forward({"paper": x_context}, params)
    out_dict = jax.block_until_ready(out_dict)
    assert set(out_dict.keys()) == {"paper"}
    assert jnp.allclose(out_dict["paper"], ref, atol=1e-5, rtol=1e-5), \
        "dict path mismatch"

    print("KERNEL_OK")
</pallas_src>

<mosaic_0001>
module attributes {stable_mosaic.version = 11 : i64} {
  func.func @_fused_linear_lrelu_kernel(%arg0: i32, %arg1: i32, %arg2: memref<16x32xf32, #tpu.memory_space<vmem>>, %arg3: memref<32x64xf32, #tpu.memory_space<vmem>>, %arg4: memref<1x64xf32, #tpu.memory_space<vmem>>, %arg5: memref<16x64xf32, #tpu.memory_space<vmem>>) attributes {dimension_semantics = [#tpu.dimension_semantics<parallel>, #tpu.dimension_semantics<parallel>], iteration_bounds = array<i64: 1, 1>, scalar_prefetch = 0 : i64, scratch_operands = 0 : i64, tpu.core_type = #tpu.core_type<tc>, window_params = [{transform_indices = @transform_0, window_bounds = array<i64: 16, 32>}, {transform_indices = @transform_1, window_bounds = array<i64: 32, 64>}, {transform_indices = @transform_2, window_bounds = array<i64: 1, 64>}, {transform_indices = @transform_3, window_bounds = array<i64: 16, 64>}]} {
    %c0 = arith.constant 0 : index
    %c0_0 = arith.constant 0 : index
    %0 = vector.load %arg2[%c0, %c0_0] : memref<16x32xf32, #tpu.memory_space<vmem>>, vector<16x32xf32>
    %c0_1 = arith.constant 0 : index
    %c0_2 = arith.constant 0 : index
    %1 = vector.load %arg3[%c0_1, %c0_2] : memref<32x64xf32, #tpu.memory_space<vmem>>, vector<32x64xf32>
    %cst = arith.constant dense<0.000000e+00> : vector<16x64xf32>
    %2 = tpu.matmul %0, %1, %cst {dimension_numbers = #tpu.dot_dimension_numbers<[1], [0], [0], [1], [0, 0, 1, 1], [], []>} : vector<16x32xf32>, vector<32x64xf32>, vector<16x64xf32> -> vector<16x64xf32>
    %c0_3 = arith.constant 0 : index
    %c0_4 = arith.constant 0 : index
    %3 = vector.load %arg4[%c0_3, %c0_4] : memref<1x64xf32, #tpu.memory_space<vmem>>, vector<1x64xf32>
    %4 = vector.broadcast %3 : vector<1x64xf32> to vector<16x64xf32>
    %5 = arith.addf %2, %4 : vector<16x64xf32>
    %cst_5 = arith.constant 0.00999999977 : f32
    %6 = vector.broadcast %cst_5 : f32 to vector<16x64xf32>
    %7 = arith.mulf %6, %5 : vector<16x64xf32>
    %8 = arith.maximumf %5, %7 : vector<16x64xf32>
    %c0_6 = arith.constant 0 : index
    %c0_7 = arith.constant 0 : index
    %9 = vector.load %arg5[%c0_6, %c0_7] : memref<16x64xf32, #tpu.memory_space<vmem>>, vector<16x64xf32>
    tpu.vector_store %arg5[%c0_6, %c0_7], %8 {strides = array<i32>} : memref<16x64xf32, #tpu.memory_space<vmem>>, vector<16x64xf32>,
    return
  }
  func.func @transform_0(%arg0: i32, %arg1: i32) -> (i32, i32) {
    %c0_i32 = arith.constant 0 : i32
    %c0_i32_0 = arith.constant 0 : i32
    return %arg1, %c0_i32 : i32, i32
  }
  func.func @transform_1(%arg0: i32, %arg1: i32) -> (i32, i32) {
    %c0_i32 = arith.constant 0 : i32
    %c0_i32_0 = arith.constant 0 : i32
    return %c0_i32, %arg0 : i32, i32
  }
  func.func @transform_2(%arg0: i32, %arg1: i32) -> (i32, i32) {
    %c0_i32 = arith.constant 0 : i32
    %c0_i32_0 = arith.constant 0 : i32
    return %c0_i32, %arg0 : i32, i32
  }
  func.func @transform_3(%arg0: i32, %arg1: i32) -> (i32, i32) {
    %c0_i32 = arith.constant 0 : i32
    return %arg1, %arg0 : i32, i32
  }
}

</mosaic_0001>

<bundles_post_ra>
// kernel: tpu_custom_call.1
= control target key start
LH: loop header
LB: loop body
LE: loop exit
PB: predicated region body
PF: predicated region fallthrough
CT: control target
= control target key end

     0   :  { %8 = vsyncpa [#allocation3], 0  ;;  %s341_s0 = inlined_call_operand.hbm [shape: f32[16,32], index: 0, kind: input, shape index: {}]   ;;  %s342_s1 = inlined_call_operand.hbm [shape: f32[32,64], index: 1, kind: input, shape index: {}]   ;;  %s343_s2 = inlined_call_operand.vmem [shape: f32[1,64], index: 2, kind: input, shape index: {}]   ;;  %s344_s3 = inlined_call_operand.hbm [shape: f32[16,64], index: 3, kind: output, shape index: {}]  }
   0x1   :  { %9 = vsyncpa [#allocation6], 0 }
   0x2   :  { %10 = vsyncpa [#allocation4], 0  ;;  %s268_s12 = smov [#allocation2]   ;;  %s196_s16 = scalar_lea.hbm %s341_s0, 256 }
   0x3   :  { %s16_s13 = sshll.u32 %s268_s12, 4  ;;  %p197_p0 = scmp.ne.s32.totalorder %s341_s0, %s196_s16  ;;  %s17_s13 = int_to_ptr.vmem [resolvable:$true] %s16_s13 }
   0x4   :  { %p200_p1 = scmp.lt.u32.totalorder %s196_s16, %s341_s0 }
   0x6   :  { %p202_p2 = pnand %p200_p1, %p197_p0 }
   0x8   :  { %205 = shalt.err (!%p202_p2)
}
   0x9   :  { %s206_s21 = scalar_lea.vmem %s17_s13, 256  ;;  %p211_p4 = scmp.lt.s32.totalorder %s17_s13, %s17_s13 }
   0xa   :  { %p207_p3 = scmp.ne.s32.totalorder %s17_s13, %s206_s21  ;;  %p212_p5 = scmp.lt.s32.totalorder %s206_s21, %s206_s21 }
   0xc   :  { %p213_p6 = por %p212_p5, %p211_p4 }
   0xe   :  { %p214_p7 = pnand %p213_p6, %p207_p3 }
  0x10   :  { %217 = shalt.err (!%p214_p7)
}
  0x11   :  { %s269_s22 = smov 128   ;;  %s270_s23 = smov 8  }
  0x12   :  { %22 = dma.hbm_to_vmem [thread:$0]  %s341_s0, 256, %s17_s13, [#allocation3], %s269_s22, %s269_s22, %s270_s23  }
  0x13   :  { %s271_s26 = smov [#allocation5]   ;;  %s218_s30 = scalar_lea.hbm %s342_s1, 512 }
  0x14   :  { %s28_s27 = sshll.u32 %s271_s26, 4  ;;  %p219_p8 = scmp.ne.s32.totalorder %s342_s1, %s218_s30  ;;  %s29_s27 = int_to_ptr.vmem [resolvable:$true] %s28_s27 }
  0x15   :  { %p222_p9 = scmp.lt.u32.totalorder %s218_s30, %s342_s1 }
  0x17   :  { %p224_p10 = pnand %p222_p9, %p219_p8 }
  0x19   :  { %227 = shalt.err (!%p224_p10)
}
  0x1a   :  { %s228_s8 = scalar_lea.vmem %s29_s27, 512  ;;  %p233_p12 = scmp.lt.s32.totalorder %s29_s27, %s29_s27 }
  0x1b   :  { %p229_p11 = scmp.ne.s32.totalorder %s29_s27, %s228_s8  ;;  %p234_p13 = scmp.lt.s32.totalorder %s228_s8, %s228_s8 }
  0x1d   :  { %p235_p0 = por %p234_p13, %p233_p12 }
  0x1f   :  { %p236_p1 = pnand %p235_p0, %p229_p11 }
  0x21   :  { %239 = shalt.err (!%p236_p1)
}
  0x22   :  { %34 = dma.hbm_to_vmem [thread:$0]  %s342_s1, 512, %s29_s27, [#allocation6], %s269_s22, %s269_s22, %s270_s23  }
  0x23   :  { %262 = dma.done.wait [#allocation3], 256  }
  0x24   :  { %263 = vsyncadd [#allocation3], 4294967040 }
  0x25   :  { %264 = dma.done.wait [#allocation6], 512  }
  0x26   :  { %265 = vsyncadd [#allocation6], 4294966784  ;;  %vm56_vm0 = vcmask 261120   ;;  %v45_v0 = vld [vmem:[#allocation5] sm:$0xff]  ;;  %v46_v1 = vld [vmem:[#allocation5 + $0x8] sm:$0xff]  ;;  %s272_s11 = smov [#allocation7]  }
  0x27   :  { %v47_v2 = vld [vmem:[#allocation5 + $0x10] sm:$0xff]  ;;  %v183_v3 = vpack.c.bf16 %v46_v1, %v45_v0  ;;  %v48_v4 = vld [vmem:[#allocation5 + $0x18] sm:$0xff]  ;;  %s150_s12 = sshll.u32 %s272_s11, 4  ;;  %vm142_vm1 = vcmask 523264   ;;  %s151_s12 = int_to_ptr.vmem [resolvable:$true] %s150_s12 }
  0x28   :  { %v43_v5 = vld [vmem:[#allocation2] sm:$0xff]  ;;  %v187_v6 = vpack.c.bf16 %v48_v4, %v47_v2  ;;  %v44_v7 = vld [vmem:[#allocation2 + $0x8] sm:$0xff]  ;;  %s240_s13 = scalar_lea.vmem %s151_s12, 256  ;;  %p245_p3 = scmp.lt.s32.totalorder %s151_s12, %s151_s12 }
  0x29   :  { %180 = vmatprep.mubr.msk.f32.mxu0 %vm56_vm0, %v43_v5  ;;  %184 = vmatprep.subr.bf16.mxu0 %v183_v3  ;;  %v163_v8 = vld [vmem:[%s343_s2] ss:$0 sm:$0xff]  ;;  %p241_p2 = scmp.ne.s32.totalorder %s151_s12, %s240_s13  ;;  %p246_p4 = scmp.lt.s32.totalorder %s240_s13, %s240_s13 }
  0x2a   :  { %186 = vmatpush3.bf16.msra.mxu0 %v183_v3 }
  0x2b   :  { %188 = vmatprep.subr.bf16.mxu0 %v187_v6  ;;  %p247_p5 = por %p246_p4, %p245_p3 }
  0x2d   :  { %p248_p6 = pnand %p247_p5, %p241_p2 }
  0x2e   :  { %190 = vmatpush3.bf16.msra.mxu0 %v187_v6 }
  0x31   :  { %181 = vmatmul.mubr.msk.f32.vlgmr.msra.gmra.mrb[0].mxu0 %vm56_vm0, %v44_v7 }
 0x104   :  { %v182_v9 = vpop.f32.mrb[0].mxu0 }
 0x105   :  { %v135_v10 = vadd.f32 %v182_v9, %v163_v8  ;;  %v129_v11 = vpop.f32.mrb[1].mxu0 }
 0x106   :  { %v130_v12 = vadd.f32 %v163_v8, %v129_v11 }
 0x107   :  { %v139_v13 = vmul.f32 0.01, %v135_v10 }
 0x108   :  { %v138_v14 = vmul.f32 0.01, %v130_v12 }
 0x109   :  { %v141_v15 = vmax.f32 %v135_v10, %v139_v13 }
 0x10a   :  { %v140_v16 = vmax.f32 %v130_v12, %v138_v14 }
 0x10b   :  { %144 = vst.msk [vmem:[#allocation7 + $0x8] sm:$0xff] %vm142_vm1, %v141_v15 }
 0x10c   :  { %143 = vst.msk [vmem:[#allocation7] sm:$0xff] %vm142_vm1, %v140_v16 }
 0x10d   :  { %251 = shalt.err (!%p248_p6)
}
 0x10e   :  { %s252_s15 = scalar_lea.hbm %s344_s3, 256 }
 0x10f   :  { %p253_p7 = scmp.ne.s32.totalorder %s344_s3, %s252_s15  ;;  %p256_p8 = scmp.lt.u32.totalorder %s252_s15, %s344_s3 }
 0x111   :  { %p258_p9 = pnand %p256_p8, %p253_p7 }
 0x113   :  { %261 = shalt.err (!%p258_p9)
}
 0x114   :  { %156 = dma.vmem_to_hbm [thread:$0]  %s151_s12, 256, %s344_s3, [#allocation4], %s269_s22, %s269_s22, %s270_s23  }
 0x115   :  { %266 = dma.done.wait [#allocation4], 256  }
 0x116   :  { %267 = vsyncadd [#allocation4], 4294967040 }
 0x117   :  { %160 = vsyncpa [#allocation3], 1 }
 0x118   :  { %161 = vsyncpa [#allocation6], 1 }
 0x119   :  { %162 = vsyncpa [#allocation4], 1 }

</bundles_post_ra>
